<compile_context>
chip_gen: v6e
topology: v6e:2x2x1
jax: 0.10.0
libtpu: 0.0.40
codegen_flags: <defaults>
</compile_context>

<pallas_src>
import math

import jax
import jax.numpy as jnp
from jax.experimental import pallas as pl
from jax.experimental.pallas import tpu as pltpu


def _make_ca_kernel(TC, HW):
    """Kernel over one block: x_ref/o_ref are (F, TC*HW); weights are tiny."""

    def kernel(x_ref, w1_ref, b1_ref, w2_ref, b2_ref, o_ref):
        # Tiny parameters, hoisted out of the per-channel loop.
        w1 = w1_ref[...].astype(jnp.float32)   # (Fr, F)  -- already scaled by 1/HW
        b1 = b1_ref[...].astype(jnp.float32)   # (Fr, 1)
        w2 = w2_ref[...].astype(jnp.float32)   # (F, Fr)
        b2 = b2_ref[...].astype(jnp.float32)   # (F, 1)

        # Per-channel processing: pool -> tiny MLP -> rescale -> store.
        # Each slice is lane-aligned ((cl*HW) % 128 == 0 when HW % 128 == 0),
        # the only f32 temp is one (F, HW) slice, and every VMEM store is a
        # lane-dense (F, HW) write.  The two matvecs per channel are noise at
        # this (mem-bound) roofline.
        for cl in range(TC):
            sl = pl.ds(cl * HW, HW)
            xs = x_ref[:, sl]                                          # (F, HW) native dtype
            pooled = jnp.sum(xs.astype(jnp.float32), axis=-1,
                             keepdims=True)                            # (F, 1)  f32 accum
            z = jnp.dot(w1, pooled, preferred_element_type=jnp.float32) + b1
            z = jnp.maximum(z, 0.0)                                    # ReLU
            logits = jnp.dot(w2, z, preferred_element_type=jnp.float32) + b2
            attn = 1.0 / (1.0 + jnp.exp(-logits))                      # sigmoid, f32-safe
            o_ref[:, sl] = xs * attn.astype(o_ref.dtype)               # (F, HW) store

    return kernel


def _choose_c_tile(C, F, HW, itemsize, *, n_batch=1,
                   budget_bytes=2 * 1024 * 1024, min_steps=8):
    """Pick the channel tile TC.

    Constraints: TC divides C; the lane extent TC*HW is a multiple of 128 (or
    the block spans the full C*HW axis); one block stays under `budget_bytes`;
    and, when possible, the grid still has >= `min_steps` steps so the
    double-buffer pipeline forms and v7x's two TensorCores both get work.
    """
    def block_bytes(t):
        return F * t * HW * itemsize

    valid = [t for t in range(1, C + 1)
             if C % t == 0 and ((t * HW) % 128 == 0 or t == C)]
    fitting = [t for t in valid if block_bytes(t) <= budget_bytes]
    if fitting:
        pipelined = [t for t in fitting if n_batch * (C // t) >= min_steps]
        if pipelined:
            return max(pipelined)      # biggest block that still pipelines
        return min(fitting)            # small problem: maximize steps / core use
    # Nothing fits the budget (e.g. huge H*W with C == 1): fall back to the
    # smallest valid tile; the wrapper raises vmem_limit_bytes to cover it.
    # TODO(synk): for configs where even a single-channel block exceeds
    # physical VMEM, a two-phase grid over HW (partial-sum pooling pass, then
    # a rescale pass) would be needed instead of the single-read fusion.
    return min(valid)


def _ca_layer_pallas(x, w1, b1, w2, b2):
    N, F, C, H, W = x.shape
    HW = H * W
    Fr = w1.shape[0]

    # Free reshapes (C, HW adjacent minor dims): no transpose, no HBM copy.
    x3 = x.reshape(N, F, C * HW)
    # Fold the average-pool 1/(H*W) into the first 1x1 conv.
    w1s = (w1.astype(jnp.float32) / float(HW))
    b1_2 = b1.reshape(Fr, 1).astype(jnp.float32)
    w2_2 = w2.astype(jnp.float32)
    b2_2 = b2.reshape(F, 1).astype(jnp.float32)

    TC = _choose_c_tile(C, F, HW, x.dtype.itemsize, n_batch=N)
    grid = (N, C // TC)                  # both axes independent -> megacore-parallel

    # Double-buffered input + output blocks, plus slack for weights / internal
    # scratch.  Explicit so large tiles never trip the scoped-VMEM default
    # (16 MiB v5e, 32 MiB v6e/v7x); 48 MiB stays under v7x's 64 MiB physical.
    block_bytes = F * TC * HW * x.dtype.itemsize
    vmem_limit = max(48 << 20, 4 * block_bytes + (2 << 20))

    kernel = _make_ca_kernel(TC, HW)
    out = pl.pallas_call(
        kernel,
        out_shape=jax.ShapeDtypeStruct((N, F, C * HW), x.dtype),
        grid_spec=pl.GridSpec(
            grid=grid,
            in_specs=[
                pl.BlockSpec((None, F, TC * HW), lambda n, c: (n, 0, c)),
                pl.BlockSpec((Fr, F), lambda n, c: (0, 0)),
                pl.BlockSpec((Fr, 1), lambda n, c: (0, 0)),
                pl.BlockSpec((F, Fr), lambda n, c: (0, 0)),
                pl.BlockSpec((F, 1), lambda n, c: (0, 0)),
            ],
            out_specs=pl.BlockSpec((None, F, TC * HW), lambda n, c: (n, 0, c)),
        ),
        compiler_params=pltpu.CompilerParams(
            dimension_semantics=("parallel", "parallel"),
            vmem_limit_bytes=vmem_limit,
        ),
    )(x3, w1s, b1_2, w2_2, b2_2)
    return out.reshape(N, F, C, H, W)


_forward = jax.jit(_ca_layer_pallas)


class CALayer2DFeatsDim:
    """JAX/Pallas port of the PyTorch CALayer2DFeatsDim module."""

    def __init__(self, channels, n_feats, reduction=4, key=None):
        self.channels = channels
        self.n_feats = n_feats
        self.reduction = reduction
        n_red = n_feats // reduction
        if key is None:
            key = jax.random.PRNGKey(1)
        k1, k2, k3, k4 = jax.random.split(key, 4)
        s1 = 1.0 / math.sqrt(n_feats)
        s2 = 1.0 / math.sqrt(n_red)
        # Deterministic synthetic parameters (stand-ins for the trained 1x1 convs).
        self.w1 = s1 * jax.random.normal(k1, (n_red, n_feats), jnp.float32)
        self.b1 = s1 * jax.random.normal(k2, (n_red,), jnp.float32)
        self.w2 = s2 * jax.random.normal(k3, (n_feats, n_red), jnp.float32)
        self.b2 = s2 * jax.random.normal(k4, (n_feats,), jnp.float32)

    def __call__(self, x):
        return _forward(x, self.w1, self.b1, self.w2, self.b2)


def _reference(x, w1, b1, w2, b2):
    xf = x.astype(jnp.float32)
    pooled = jnp.mean(xf, axis=(3, 4))                                   # (N, F, C)
    z = jnp.einsum("rf,nfc->nrc", w1, pooled) + b1[None, :, None]
    z = jnp.maximum(z, 0.0)
    logits = jnp.einsum("fr,nrc->nfc", w2, z) + b2[None, :, None]
    attn = jax.nn.sigmoid(logits)
    return xf * attn[:, :, :, None, None]


if __name__ == "__main__":
    key = jax.random.PRNGKey(0)
    kparam, kx, kparam2, kx2 = jax.random.split(key, 4)

    # Config 1: N=2, F=32 (reduction 4 -> 8), C=4, 16x16 spatial (HW=256).
    # Tile chooser picks TC=1 -> grid (2, 4): 8 steps, blocks fully packed.
    N, F, C, H, W = 2, 32, 4, 16, 16
    mod = CALayer2DFeatsDim(channels=C, n_feats=F, reduction=4, key=kparam)
    x = jax.random.normal(kx, (N, F, C, H, W), jnp.float32)
    out = jax.block_until_ready(mod(x))
    ref = _reference(x, mod.w1, mod.b1, mod.w2, mod.b2)
    assert out.shape == (N, F, C, H, W), out.shape
    assert jnp.allclose(out, ref, atol=1e-4, rtol=1e-4), "mismatch vs reference (cfg1)"

    # Config 2: exercises a multi-channel tile (TC=2 -> grid (1, 8)).
    N2, C2, H2, W2 = 1, 32, 16, 16
    mod2 = CALayer2DFeatsDim(channels=C2, n_feats=F, reduction=4, key=kparam2)
    x2 = jax.random.normal(kx2, (N2, F, C2, H2, W2), jnp.float32)
    out2 = jax.block_until_ready(mod2(x2))
    ref2 = _reference(x2, mod2.w1, mod2.b1, mod2.w2, mod2.b2)
    assert out2.shape == (N2, F, C2, H2, W2), out2.shape
    assert jnp.allclose(out2, ref2, atol=1e-4, rtol=1e-4), "mismatch vs reference (cfg2)"

    print("KERNEL_OK")
</pallas_src>

<mosaic_0001>
module attributes {stable_mosaic.version = 11 : i64} {
  func.func @kernel(%arg0: i32, %arg1: i32, %arg2: memref<1x32x256xf32, #tpu.memory_space<vmem>>, %arg3: memref<8x32xf32, #tpu.memory_space<vmem>>, %arg4: memref<8x1xf32, #tpu.memory_space<vmem>>, %arg5: memref<32x8xf32, #tpu.memory_space<vmem>>, %arg6: memref<32x1xf32, #tpu.memory_space<vmem>>, %arg7: memref<1x32x256xf32, #tpu.memory_space<vmem>>) attributes {dimension_semantics = [#tpu.dimension_semantics<parallel>, #tpu.dimension_semantics<parallel>], iteration_bounds = array<i64: 2, 4>, scalar_prefetch = 0 : i64, scratch_operands = 0 : i64, tpu.core_type = #tpu.core_type<tc>, window_params = [{transform_indices = @transform_0, window_bounds = array<i64: 1, 32, 256>}, {pipeline_mode = #tpu.pipeline_mode<synchronous>, transform_indices = @transform_1, window_bounds = array<i64: 8, 32>}, {pipeline_mode = #tpu.pipeline_mode<synchronous>, transform_indices = @transform_2, window_bounds = array<i64: 8, 1>}, {pipeline_mode = #tpu.pipeline_mode<synchronous>, transform_indices = @transform_3, window_bounds = array<i64: 32, 8>}, {pipeline_mode = #tpu.pipeline_mode<synchronous>, transform_indices = @transform_4, window_bounds = array<i64: 32, 1>}, {transform_indices = @transform_5, window_bounds = array<i64: 1, 32, 256>}]} {
    %c0 = arith.constant 0 : index
    %c0_0 = arith.constant 0 : index
    %0 = vector.load %arg3[%c0, %c0_0] : memref<8x32xf32, #tpu.memory_space<vmem>>, vector<8x32xf32>
    %c0_1 = arith.constant 0 : index
    %c0_2 = arith.constant 0 : index
    %1 = vector.load %arg4[%c0_1, %c0_2] : memref<8x1xf32, #tpu.memory_space<vmem>>, vector<8x1xf32>
    %c0_3 = arith.constant 0 : index
    %c0_4 = arith.constant 0 : index
    %2 = vector.load %arg5[%c0_3, %c0_4] : memref<32x8xf32, #tpu.memory_space<vmem>>, vector<32x8xf32>
    %c0_5 = arith.constant 0 : index
    %c0_6 = arith.constant 0 : index
    %3 = vector.load %arg6[%c0_5, %c0_6] : memref<32x1xf32, #tpu.memory_space<vmem>>, vector<32x1xf32>
    %c0_7 = arith.constant 0 : index
    %c0_8 = arith.constant 0 : index
    %c0_9 = arith.constant 0 : index
    %4 = vector.load %arg2[%c0_7, %c0_8, %c0_9] : memref<1x32x256xf32, #tpu.memory_space<vmem>>, vector<1x32x256xf32>
    %5 = vector.shape_cast %4 : vector<1x32x256xf32> to vector<32x256xf32>
    %cst = arith.constant dense<0.000000e+00> : vector<32xf32>
    %6 = vector.multi_reduction <add>, %5, %cst [1] : vector<32x256xf32> to vector<32xf32>
    %7 = vector.shape_cast %6 : vector<32xf32> to vector<32x1xf32>
    %cst_10 = arith.constant dense<0.000000e+00> : vector<8x1xf32>
    %8 = tpu.matmul %0, %7, %cst_10 {dimension_numbers = #tpu.dot_dimension_numbers<[1], [0], [0], [1], [0, 0, 1, 1], [], []>} : vector<8x32xf32>, vector<32x1xf32>, vector<8x1xf32> -> vector<8x1xf32>
    %9 = arith.addf %8, %1 : vector<8x1xf32>
    %cst_11 = arith.constant 0.000000e+00 : f32
    %10 = vector.broadcast %cst_11 : f32 to vector<8x1xf32>
    %11 = arith.maximumf %9, %10 : vector<8x1xf32>
    %cst_12 = arith.constant dense<0.000000e+00> : vector<32x1xf32>
    %12 = tpu.matmul %2, %11, %cst_12 {dimension_numbers = #tpu.dot_dimension_numbers<[1], [0], [0], [1], [0, 0, 1, 1], [], []>} : vector<32x8xf32>, vector<8x1xf32>, vector<32x1xf32> -> vector<32x1xf32>
    %13 = arith.addf %12, %3 : vector<32x1xf32>
    %cst_13 = arith.constant 0.000000e+00 : f32
    %14 = vector.broadcast %cst_13 : f32 to vector<32x1xf32>
    %15 = arith.subf %14, %13 : vector<32x1xf32>
    %16 = math.exp %15 : vector<32x1xf32>
    %cst_14 = arith.constant 1.000000e+00 : f32
    %17 = vector.broadcast %cst_14 : f32 to vector<32x1xf32>
    %18 = arith.addf %17, %16 : vector<32x1xf32>
    %cst_15 = arith.constant 1.000000e+00 : f32
    %19 = vector.broadcast %cst_15 : f32 to vector<32x1xf32>
    %20 = arith.divf %19, %18 : vector<32x1xf32>
    %21 = vector.broadcast %20 : vector<32x1xf32> to vector<32x256xf32>
    %22 = arith.mulf %5, %21 : vector<32x256xf32>
    %c0_16 = arith.constant 0 : index
    %c0_17 = arith.constant 0 : index
    %c0_18 = arith.constant 0 : index
    %23 = vector.load %arg7[%c0_16, %c0_17, %c0_18] : memref<1x32x256xf32, #tpu.memory_space<vmem>>, vector<1x32x256xf32>
    %24 = vector.shape_cast %23 : vector<1x32x256xf32> to vector<32x256xf32>
    %25 = vector.shape_cast %22 : vector<32x256xf32> to vector<1x32x256xf32>
    tpu.vector_store %arg7[%c0_16, %c0_17, %c0_18], %25 {strides = array<i32>} : memref<1x32x256xf32, #tpu.memory_space<vmem>>, vector<1x32x256xf32>,
    return
  }
  func.func @transform_0(%arg0: i32, %arg1: i32) -> (i32, i32, i32) {
    %c0_i32 = arith.constant 0 : i32
    %c0_i32_0 = arith.constant 0 : i32
    return %arg0, %c0_i32, %arg1 : i32, i32, i32
  }
  func.func @transform_1(%arg0: i32, %arg1: i32) -> (i32, i32) {
    %c0_i32 = arith.constant 0 : i32
    %c0_i32_0 = arith.constant 0 : i32
    %c0_i32_1 = arith.constant 0 : i32
    return %c0_i32, %c0_i32_0 : i32, i32
  }
  func.func @transform_2(%arg0: i32, %arg1: i32) -> (i32, i32) {
    %c0_i32 = arith.constant 0 : i32
    %c0_i32_0 = arith.constant 0 : i32
    %c0_i32_1 = arith.constant 0 : i32
    return %c0_i32, %c0_i32_0 : i32, i32
  }
  func.func @transform_3(%arg0: i32, %arg1: i32) -> (i32, i32) {
    %c0_i32 = arith.constant 0 : i32
    %c0_i32_0 = arith.constant 0 : i32
    %c0_i32_1 = arith.constant 0 : i32
    return %c0_i32, %c0_i32_0 : i32, i32
  }
  func.func @transform_4(%arg0: i32, %arg1: i32) -> (i32, i32) {
    %c0_i32 = arith.constant 0 : i32
    %c0_i32_0 = arith.constant 0 : i32
    %c0_i32_1 = arith.constant 0 : i32
    return %c0_i32, %c0_i32_0 : i32, i32
  }
  func.func @transform_5(%arg0: i32, %arg1: i32) -> (i32, i32, i32) {
    %c0_i32 = arith.constant 0 : i32
    %c0_i32_0 = arith.constant 0 : i32
    return %arg0, %c0_i32, %arg1 : i32, i32, i32
  }
}

</mosaic_0001>

<bundles_post_ra>
// kernel: _ca_layer_pallas.1
= control target key start
LH: loop header
LB: loop body
LE: loop exit
PB: predicated region body
PF: predicated region fallthrough
CT: control target
= control target key end

     0   :  { %s870_s18 = smov 0   ;;  %s872_s19 = smov 0   ;;  %s1032_s0 = inlined_call_operand.vmem [shape: f32[2,32,1024], index: 0, kind: input, shape index: {}]   ;;  %s1033_s1 = inlined_call_operand.vmem [shape: f32[8,32], index: 1, kind: input, shape index: {}]   ;;  %s1034_s2 = inlined_call_operand.vmem [shape: f32[8,1], index: 2, kind: input, shape index: {}]   ;;  %s1035_s3 = inlined_call_operand.vmem [shape: f32[32,8], index: 3, kind: input, shape index: {}]   ;;  %s1036_s4 = inlined_call_operand.vmem [shape: f32[32,1], index: 4, kind: input, shape index: {}]   ;;  %s1037_s5 = inlined_call_operand.vmem [shape: f32[2,32,1024], index: 5, kind: output, shape index: {}]  }
   0x1   :  { %s874_s20 = smov 0   ;;  %s876_s21 = smov 0  }
   0x2   :  { %s878_s22 = smov 0   ;;  %s880_s23 = smov 0  }
   0x3   :  { %s882_s24 = smov 0  }
   0x4 LB: > { %s24_s25 = sadd.s32 1, %s827_s22  ;;  %s27_s26 = sadd.s32 1, %s831_s23  ;;  %s835_s24 = sphi %s882_s24, %s15_s24   ;;  %s831_s23 = sphi %s880_s23, %s1044_s23   ;;  %s827_s22 = sphi %s878_s22, %s1043_s22   ;;  %s823_s21 = sphi %s876_s21, %s1042_s21   ;;  %s819_s20 = sphi %s874_s20, %s1041_s20   ;;  %s815_s19 = sphi %s872_s19, %s1040_s19   ;;  %s811_s18 = sphi %s870_s18, %s1039_s18  }
   0x5   : > { %p25_p0 = scmp.ge.s32.totalorder %s24_s25, 4  ;;  %s653_s27 = sadd.s32 4294967295, %s835_s24  }
   0x6   : > { %p43_p1 = scmp.ne.s32.totalorder %s815_s19, %s811_s18  ;;  %p44_p2 = scmp.eq.s32.totalorder %s835_s24, 0 }
   0x7   : > { %s1046_s25 = smov (%p25_p0, %s24_s25), 0  ;;  %s1048_s26 = smov (!%p25_p0, %s27_s26), %s831_s23 }
   0x8   : > { %p29_p3 = scmp.ge.s32.totalorder %s1048_s26, 2  ;;  %p159_p4 = scmp.eq.s32.totalorder %s653_s27, 7 }
   0x9   : > { %s32_s28 = ssub.s32 %s827_s22, %s1046_s25  ;;  %p45_p5 = por %p44_p2, %p43_p1 }
   0xa   : > { %s1050_s26 = smov (%p29_p3, %s1048_s26), 0  ;;  %p918_p6 = por %p159_p4, %p43_p1 }
   0xb   : > { %s31_s30 = ssub.s32 %s831_s23, %s1050_s26  ;;  %s36_s7 = sadd.s32 1, %s815_s19 }
   0xc   : > { %s33_s6 = sor.u32 %s32_s28, %s31_s30  ;;  %p656_p8 = scmp.ge.s32.totalorder %s835_s24, 8 }
   0xd   : > { %p34_p7 = scmp.eq.s32.totalorder %s33_s6, 0 }
   0xe   : > { %193 = sbr.rel (%p656_p8) target bundleno = 30 (0x1e), region = 32 }
   0xf   : > { %s926_s8 = scalar_select %p34_p7, %s815_s19, %s36_s7  }
  0x13   : > { %196 = sbr.rel (!%p45_p5) target bundleno = 30 (0x1e), region = 36  ;;  %s198_s9 = sand.u32 (%p45_p5), 1, %s815_s19  }
  0x14   : > { %s658_s10 = sshll.u32 (%p45_p5), %s827_s22, 1  ;;  %s657_s11 = sshll.u32 (%p45_p5), %s198_s9, 6 }
  0x15   : > { %s659_s12 = sshll.u32 (%p45_p5), %s831_s23, 5  ;;  %s200_s27 = scalar_lea.vmem (%p45_p5), [#allocation2], %s657_s11 }
  0x16   : > { %s203_s13 = sadd.s32 (%p45_p5), %s659_s12, %s658_s10 }
  0x17   : > { %s660_s14 = sshll.u32 (%p45_p5), %s203_s13, 3 }
  0x18   : > { %s205_s17 = scalar_lea.vmem %s1032_s0, %s660_s14 }
  0x19   : > { %v218_v0 = vld [vmem:[%s205_s17] sm:$0xff]  ;;  %v220_v1 = vld [vmem:[%s205_s17 + $0x8] sm:$0xff] }
  0x1a   : > { %v222_v2 = vld [vmem:[%s205_s17 + $0x40] sm:$0xff]  ;;  %219 = vst [vmem:[%s200_s27] sm:$0xff] %v218_v0  ;;  %221 = vst [vmem:[%s200_s27 + $0x8] sm:$0xff] %v220_v1  ;;  %v224_v3 = vld [vmem:[%s205_s17 + $0x48] sm:$0xff] }
  0x1b   : > { %223 = vst [vmem:[%s200_s27 + $0x10] sm:$0xff] %v222_v2  ;;  %v226_v4 = vld [vmem:[%s205_s17 + $0x80] sm:$0xff]  ;;  %v228_v5 = vld [vmem:[%s205_s17 + $0x88] sm:$0xff]  ;;  %225 = vst [vmem:[%s200_s27 + $0x18] sm:$0xff] %v224_v3 }
  0x1c   : > { %227 = vst [vmem:[%s200_s27 + $0x20] sm:$0xff] %v226_v4  ;;  %229 = vst [vmem:[%s200_s27 + $0x28] sm:$0xff] %v228_v5  ;;  %v230_v6 = vld [vmem:[%s205_s17 + $0xc0] sm:$0xff]  ;;  %v232_v7 = vld [vmem:[%s205_s17 + $0xc8] sm:$0xff] }
  0x1d   : > { %231 = vst [vmem:[%s200_s27 + $0x30] sm:$0xff] %v230_v6  ;;  %233 = vst [vmem:[%s200_s27 + $0x38] sm:$0xff] %v232_v7 }
  0x1e PF: > { %p661_p9 = scmp.ge.s32.totalorder %s835_s24, 1  ;;  %p238_p10 = scmp.lt.s32.totalorder %s835_s24, 9 }
  0x20   : > { %p239_p11 = pnand %p661_p9, %p238_p10 }
  0x21   : > { %s245_s28 = sand.u32 (!%p239_p11), 1, %s811_s18  }
  0x22   : > { %242 = sbr.rel (%p239_p11) target bundleno = 762 (0x2fa), region = 59  ;;  %s938_s30 = sshll.u32 (!%p239_p11), %s245_s28, 6 }
  0x23   : > { %s247_s6 = scalar_lea.vmem (!%p239_p11), [#allocation2], %s938_s30  ;;  %s270_s13 = scalar_lea.vmem (!%p239_p11), [#allocation3], %s938_s30 }
  0x27   : > { %v837_v8 = vmov 0.0   ;;  %v941_v9 = vld [vmem:[%s247_s6 + $0x30] sm:$0xff]  ;;  %v943_v10 = vld [vmem:[%s247_s6 + $0x38] sm:$0xff]  ;;  %v945_v11 = vld [vmem:[%s247_s6 + $0x20] sm:$0xff]  ;;  %vm838_vm0 = vmmov 0   ;;  %vm303_vm1 = vcmask 261120  }
  0x28   : > { %685 = vmatprep.subr.mxu0 %v837_v8  ;;  %v300_v12 = vadd.f32 %v943_v10, %v941_v9  ;;  %v949_v13 = vld [vmem:[%s247_s6 + $0x28] sm:$0xff]  ;;  %v951_v14 = vld [vmem:[%s247_s6 + $0x10] sm:$0xff]  ;;  %v953_v15 = vld [vmem:[%s247_s6 + $0x18] sm:$0xff]  ;;  %693 = vmatprep.mubr.msk.f32.mxu0 %vm838_vm0, %v837_v8  ;;  %vm378_vm2 = vcmask 64512   ;;  %v839_v35 = vmov 0   ;;  %s670_s30 = sshll.u32 (%p918_p6), %s819_s20, 1 }
  0x29   : > { %v294_v16 = vadd.f32 %v953_v15, %v951_v14  ;;  %v957_v17 = vld [vmem:[%s247_s6] sm:$0xff]  ;;  %v959_v18 = vld [vmem:[%s247_s6 + $0x8] sm:$0xff]  ;;  %v297_v19 = vadd.f32 %v949_v13, %v945_v11  ;;  %v277_v33 = vld [vmem:[%s1035_s3 + $0x10] sm:$0xff]  ;;  %764 = vset.pattern.permute.xlu1 %v839_v35  ;;  %763 = vset.pattern.permute.xlu0 %v839_v35  ;;  %s671_s14 = sshll.u32 (%p918_p6), %s823_s21, 5 }
  0x2a   : > { %301 = vadd.xlane.f32.xlu0 %v300_v12  ;;  %v291_v20 = vadd.f32 %v959_v18, %v957_v17  ;;  %v273_v25 = vld [vmem:[%s1033_s1] sm:$0xff]  ;;  %v276_v32 = vld [vmem:[%s1035_s3 + $0x8] sm:$0xff]  ;;  %v278_v34 = vld [vmem:[%s1035_s3 + $0x18] sm:$0xff]  ;;  %s545_s15 = sadd.s32 (%p918_p6), %s671_s14, %s670_s30 }
  0x2b   : > { %295 = vadd.xlane.f32.xlu1 %v294_v16  ;;  %v275_v26 = vld [vmem:[%s1035_s3] sm:$0xff]  ;;  %v280_v36 = vld [vmem:[%s1036_s4 + $0x8] sm:$0xff]  ;;  %v282_v41 = vld [vmem:[%s1036_s4 + $0x18] sm:$0xff]  ;;  %s672_s16 = sshll.u32 (%p918_p6), %s545_s15, 3 }
  0x2c   : > { %698 = vmatprep.mubr.msk.f32.mxu1 %vm378_vm2, %v275_v26  ;;  %v274_v27 = vld [vmem:[%s1034_s2] sm:$0xff]  ;;  %v281_v45 = vld [vmem:[%s1036_s4 + $0x10] sm:$0xff]  ;;  %s547_s28 = scalar_lea.vmem (%p918_p6), %s1037_s5, %s672_s16 }
  0x2d   : > { %v279_v38 = vld [vmem:[%s1036_s4] sm:$0xff] }
  0x2e   : > { %298 = vadd.xlane.f32.xlu0 %v297_v19 }
  0x2f   : > { %292 = vadd.xlane.f32.xlu1 %v291_v20 }
  0xb3   : > { %v302_v21 = vpop.xlane.xlu0 %301 }
  0xb4   : > { %686 = vmatpush3.msra.mxu0 %v302_v21  ;;  %v296_v22 = vpop.xlane.xlu1 %295 }
  0xb5   : > { %687 = vmatprep.subr.mxu0 %v837_v8 }
  0xb7   : > { %v299_v23 = vpop.xlane.xlu0 %298 }
  0xb8   : > { %688 = vmatpush3.msra.mxu0 %v299_v23  ;;  %v293_v24 = vpop.xlane.xlu1 %292 }
  0xb9   : > { %689 = vmatprep.subr.mxu0 %v837_v8 }
  0xba   : > { %690 = vmatpush3.msra.mxu0 %v296_v22 }
  0xbb   : > { %691 = vmatprep.subr.mxu0 %v837_v8 }
  0xbc   : > { %692 = vmatpush3.msra.mxu0 %v293_v24 }
  0xbd   : > { %694 = vmatmul.mubr.msk.f32.vlgmr.msra.gmra.mxu0 %vm303_vm1, %v273_v25 }
 0x17d   : > { %v373_v28 = vpop.f32.mrf.mxu0 }
 0x17e   : > { %v374_v29 = vadd.f32 %v373_v28, %v274_v27 }
 0x17f   : > { %v695_v30 = vpop.f32.mrf.mxu0 }
 0x180   : > { %v377_v31 = vmax.f32 %v374_v29, 0.0 }
 0x182   : > { %696 = vmatprep.subr.mxu1 %v377_v31 }
 0x183   : > { %697 = vmatpush3.msra.mxu1 %v377_v31 }
 0x184   : > { %699 = vmatmul.mubr.msk.f32.vlgmr.msra.gmra.mxu1 %vm378_vm2, %v276_v32 }
 0x185   : > { %701 = vmatprep.mubr.msk.f32.mxu1 %vm378_vm2, %v277_v33 }
 0x188   : > { %702 = vmatmul.mubr.msk.f32.gmra.mxu1 %vm378_vm2, %v278_v34 }
 0x244   : > { %v700_v37 = vpop.f32.mrf.mxu1 }
 0x245   : > { %v463_v39 = vadd.f32 %v700_v37, %v280_v36 }
 0x246   : > { %v457_v40 = vpop.f32.mrf.mxu1 }
 0x247   : > { %v477_v42 = vsub.f32 0.0, %v463_v39  ;;  %v458_v43 = vadd.f32 %v457_v40, %v279_v38 }
 0x248   : > { %v703_v44 = vpop.f32.mrf.mxu1 }
 0x249   : > { %v482_v46 = vmul.f32 1.442695, %v477_v42  ;;  %v476_v47 = vsub.f32 0.0, %v458_v43  ;;  %v473_v48 = vadd.f32 %v703_v44, %v282_v41 }
 0x24a   : > { %v467_v49 = vpop.f32.mrf.mxu1 }
 0x24b   : > { %765 = vpow2.f32 %v482_v46  ;;  %v480_v50 = vmul.f32 1.442695, %v476_v47  ;;  %v479_v51 = vsub.f32 0.0, %v473_v48  ;;  %v468_v52 = vadd.f32 %v467_v49, %v281_v45 }
 0x24d   : > { %767 = vpow2.f32 %v480_v50  ;;  %v486_v53 = vmul.f32 1.442695, %v479_v51  ;;  %v478_v54 = vsub.f32 0.0, %v468_v52 }
 0x24f   : > { %v484_v55 = vmul.f32 1.442695, %v478_v54  ;;  %769 = vpow2.f32 %v486_v53 }
 0x251   : > { %771 = vpow2.f32 %v484_v55 }
 0x258   : > { %v766_v56 = vpop.eup %765 }
 0x259   : > { %v489_v57 = vadd.f32 1.0, %v766_v56 }
 0x25a   : > { %v768_v58 = vpop.eup %767 }
 0x25b   : > { %773 = vrcp.f32 %v489_v57  ;;  %v488_v59 = vadd.f32 1.0, %v768_v58 }
 0x25c   : > { %v770_v60 = vpop.eup %769 }
 0x25d   : > { %775 = vrcp.f32 %v488_v59  ;;  %v491_v63 = vadd.f32 1.0, %v770_v60 }
 0x25e   : > { %v772_v61 = vpop.eup %771 }
 0x25f   : > { %v490_v62 = vadd.f32 1.0, %v772_v61 }
 0x261   : > { %777 = vrcp.f32 %v490_v62 }
 0x262   : > { %779 = vrcp.f32 %v491_v63 }
 0x268   : > { %v774_v0 = vpop.eup %773 }
 0x269   : > { %507 = vperm.xlu1 %764, %v774_v0  }
 0x26a   : > { %v776_v1 = vpop.eup %775 }
 0x26b   : > { %502 = vperm.xlu0 %763, %v776_v1  }
 0x26e   : > { %v778_v2 = vpop.eup %777 }
 0x26f   : > { %512 = vperm.xlu1 %764, %v778_v2   ;;  %v780_v3 = vpop.eup %779 }
 0x273   : > { %517 = vperm.xlu1 %764, %v780_v3  }
 0x2e4   : > { %v508_v4 = vpop.permute.xlu1 %507 }
 0x2e5   : > { %v522_v5 = vmul.f32 %v508_v4, %v951_v14  ;;  %v523_v6 = vmul.f32 %v508_v4, %v953_v15 }
 0x2e6   : > { %v503_v7 = vpop.permute.xlu0 %502 }
 0x2e7   : > { %530 = vst [vmem:[%s270_s13 + $0x10] sm:$0xff] %v522_v5  ;;  %531 = vst [vmem:[%s270_s13 + $0x18] sm:$0xff] %v523_v6  ;;  %v520_v8 = vmul.f32 %v503_v7, %v957_v17  ;;  %v521_v12 = vmul.f32 %v503_v7, %v959_v18 }
 0x2e9   : > { %528 = vst [vmem:[%s270_s13] sm:$0xff] %v520_v8  ;;  %529 = vst [vmem:[%s270_s13 + $0x8] sm:$0xff] %v521_v12 }
 0x2ea   : > { %v513_v16 = vpop.permute.xlu1 %512 }
 0x2eb   : > { %v524_v19 = vmul.f32 %v513_v16, %v945_v11  ;;  %v525_v20 = vmul.f32 %v513_v16, %v949_v13 }
 0x2ed   : > { %532 = vst [vmem:[%s270_s13 + $0x20] sm:$0xff] %v524_v19  ;;  %533 = vst [vmem:[%s270_s13 + $0x28] sm:$0xff] %v525_v20  ;;  %542 = sbr.rel (!%p918_p6) target bundleno = 762 (0x2fa), region = 67 }
 0x2ee   : > { %v518_v14 = vpop.permute.xlu1 %517  ;;  %v564_v18 = vld [vmem:[%s270_s13 + $0x10] sm:$0xff] (%p918_p6)  ;;  %v566_v13 = vld [vmem:[%s270_s13 + $0x18] sm:$0xff] (%p918_p6) }
 0x2ef   : > { %v526_v15 = vmul.f32 %v518_v14, %v941_v9  ;;  %v527_v21 = vmul.f32 %v518_v14, %v943_v10  ;;  %565 = vst [vmem:[%s547_s28 + $0x40] sm:$0xff] (%p918_p6), %v564_v18  ;;  %567 = vst [vmem:[%s547_s28 + $0x48] sm:$0xff] (%p918_p6), %v566_v13 }
 0x2f0   : > { %v560_v17 = vld [vmem:[%s270_s13] sm:$0xff] (%p918_p6)  ;;  %v562_v11 = vld [vmem:[%s270_s13 + $0x8] sm:$0xff] (%p918_p6) }
 0x2f1   : > { %534 = vst [vmem:[%s270_s13 + $0x30] sm:$0xff] %v526_v15  ;;  %535 = vst [vmem:[%s270_s13 + $0x38] sm:$0xff] %v527_v21 }
 0x2f2   : > { %561 = vst [vmem:[%s547_s28] sm:$0xff] %v560_v17  ;;  %563 = vst [vmem:[%s547_s28 + $0x8] sm:$0xff] %v562_v11 }
 0x2f4   : > { %v568_v22 = vld [vmem:[%s270_s13 + $0x20] sm:$0xff]  ;;  %v570_v23 = vld [vmem:[%s270_s13 + $0x28] sm:$0xff] }
 0x2f5   : > { %569 = vst [vmem:[%s547_s28 + $0x80] sm:$0xff] %v568_v22  ;;  %571 = vst [vmem:[%s547_s28 + $0x88] sm:$0xff] %v570_v23 }
 0x2f8   : > { %v572_v9 = vld [vmem:[%s270_s13 + $0x30] sm:$0xff]  ;;  %v574_v24 = vld [vmem:[%s270_s13 + $0x38] sm:$0xff] }
 0x2f9   : > { %573 = vst [vmem:[%s547_s28 + $0xc0] sm:$0xff] %v572_v9  ;;  %575 = vst [vmem:[%s547_s28 + $0xc8] sm:$0xff] %v574_v24 }
 0x2fa PF: > { %s15_s24 = sadd.s32 1, %s835_s24   ;;  %s1039_s18 = smov %s815_s19 }
 0x2fb   : > { %p12_p12 = scmp.ge.s32.totalorder %s15_s24, 10   ;;  %s1040_s19 = smov %s926_s8 }
 0x2fc   : > { %s1041_s20 = smov %s827_s22  ;;  %s1042_s21 = smov %s831_s23 }
 0x2fd   : > { %s1043_s22 = smov %s1046_s25  ;;  %s1044_s23 = smov %s1050_s26 }
 0x2fe   :  { %14 = sbr.rel (!%p12_p12) target bundleno = 4 (0x4), region = 121 }

</bundles_post_ra>
